<compile_context>
chip_gen: v7x
topology: tpu7x:2x2x1
jax: 0.10.0
libtpu: 0.0.40
codegen_flags: <defaults>
</compile_context>

<pallas_src>
import functools

import jax
import jax.numpy as jnp
from jax.experimental import pallas as pl
from jax.experimental.pallas import tpu as pltpu


def _round_up(x: int, m: int) -> int:
    return ((x + m - 1) // m) * m


# Largest packed weight bank we keep VMEM-resident.  Conservative against
# v7x's 64 MiB physical / 32 MiB default-scoped VMEM, leaving room for the
# double-buffered x / output tiles and compiler temporaries.
_RESIDENT_BANK_BYTES = 24 << 20


# -----------------------------------------------------------------------------
# Kernels
# -----------------------------------------------------------------------------
def _mlp_geo_kernel_resident(idx_ref, x_ref, w1_bank_ref, w2_bank_ref, o_ref):
    """Whole packed weight bank is VMEM-resident; select the MLP in-kernel."""
    # idx_ref     : (Q,) int32 SMEM scalar-prefetch
    # x_ref       : (TILE_B, IN_PAD)           VMEM, already in weight dtype
    # w1_bank_ref : (AMOUNT, IN_PAD, HID_PAD)  VMEM (full bank, loaded once)
    # w2_bank_ref : (AMOUNT, HID_PAD, OUT_PAD) VMEM (full bank, loaded once)
    # o_ref       : (TILE_B, OUT_PAD)          VMEM, lane-dense
    q = pl.program_id(0)
    idx = idx_ref[q]
    x = x_ref[...]
    h = jnp.dot(x, w1_bank_ref[idx], preferred_element_type=jnp.float32)
    h = jnp.maximum(h, 0.0)                       # ReLU stays in f32 (VPU)
    z = jnp.dot(h.astype(w2_bank_ref.dtype), w2_bank_ref[idx],
                preferred_element_type=jnp.float32)
    o_ref[...] = z.astype(o_ref.dtype)


def _mlp_geo_kernel_streamed(idx_ref, x_ref, w1_ref, w2_ref, o_ref):
    """Per-step weight gather: index_maps DMA only MLP[idx[q]]'s weights."""
    del idx_ref  # consumed by the index_maps
    x = x_ref[...]
    h = jnp.dot(x, w1_ref[...], preferred_element_type=jnp.float32)
    h = jnp.maximum(h, 0.0)
    z = jnp.dot(h.astype(w2_ref.dtype), w2_ref[...],
                preferred_element_type=jnp.float32)
    o_ref[...] = z.astype(o_ref.dtype)


# -----------------------------------------------------------------------------
# One-time weight repacking: lane-dense + biases folded into the matmuls.
# -----------------------------------------------------------------------------
def pack_mlp_geo_params(w1, b1, w2, b2, weight_dtype=jnp.bfloat16):
    """Repack the MLP bank into lane-dense, bias-folded weights.

    w1: (amount, in, hid)   b1: (amount, hid)
    w2: (amount, hid, out)  b2: (amount, out)

    Returns (w1p, w2p) with
      w1p: (amount, IN_PAD, HID_PAD),  IN_PAD  = roundup(in + 1, 128)
      w2p: (amount, HID_PAD, OUT_PAD), HID_PAD = roundup(hid + 1, 128)
                                       OUT_PAD = roundup(out, 128)
    Row `in` of w1p holds b1 plus a 1.0 feeding the bias unit (column `hid`)
    whose post-ReLU activation is always 1; row `hid` of w2p holds b2.

    bf16 is the default on all generations (the MXU is bf16-native on
    v5e/v6e/v7x); note the wrapper also casts x to the weight dtype at the
    MXU input, so bf16 reduces input precision as well, not just weights.
    Pass weight_dtype=jnp.float32 for full-precision matmuls.
    """
    amount, in_size, hidden = w1.shape
    out_size = w2.shape[-1]
    in_pad = _round_up(in_size + 1, 128)
    hid_pad = _round_up(hidden + 1, 128)
    out_pad = _round_up(out_size, 128)

    w1p = jnp.zeros((amount, in_pad, hid_pad), weight_dtype)
    w1p = w1p.at[:, :in_size, :hidden].set(w1.astype(weight_dtype))
    w1p = w1p.at[:, in_size, :hidden].set(b1.astype(weight_dtype))
    w1p = w1p.at[:, in_size, hidden].set(jnp.ones((amount,), weight_dtype))

    w2p = jnp.zeros((amount, hid_pad, out_pad), weight_dtype)
    w2p = w2p.at[:, :hidden, :out_size].set(w2.astype(weight_dtype))
    w2p = w2p.at[:, hidden, :out_size].set(b2.astype(weight_dtype))
    return w1p, w2p


# -----------------------------------------------------------------------------
# Forward wrappers
# -----------------------------------------------------------------------------
@functools.partial(jax.jit, static_argnames=("out_size", "force_streamed"))
def mlp_geo_forward_multi(x, idxs, w1p, w2p, *, out_size, force_streamed=False):
    """Apply MLP[idxs[q]] to x for every q in one pallas_call.

    Returns an array of shape (num_queries, batch, out_size).
    """
    batch, in_size = x.shape
    amount, in_pad, hid_pad = w1p.shape
    out_pad = w2p.shape[-1]
    num_q = idxs.shape[0]
    wdtype = w1p.dtype
    w_bytes = jnp.dtype(wdtype).itemsize
    o_bytes = jnp.dtype(x.dtype).itemsize

    # --- batch tiling (second "parallel" grid axis) --------------------------
    b_al = _round_up(batch, 8)
    if b_al > 256:
        tile_b = 256                    # fills the MXU M dimension on v6e/v7x
        b_pad = _round_up(b_al, tile_b)
    else:
        tile_b = b_al
        b_pad = b_al
    num_b = b_pad // tile_b

    # Pad x, append the constant-1 feature driving the folded biases, and cast
    # to the weight dtype here once (x is grid-invariant; hoists the per-step
    # MXU-input cast out of the kernel).
    x_pad = jnp.zeros((b_pad, in_pad), wdtype)
    x_pad = x_pad.at[:batch, :in_size].set(x.astype(wdtype))
    x_pad = x_pad.at[:batch, in_size].set(jnp.ones((batch,), wdtype))

    # OOB block indices are not range-checked on TPU -> clamp.
    # (PyTorch would raise IndexError; this silently redirects instead.)
    idxs = jnp.clip(idxs.astype(jnp.int32), 0, amount - 1)

    bank_bytes = amount * (in_pad * hid_pad + hid_pad * out_pad) * w_bytes
    x_blk = tile_b * in_pad * w_bytes
    o_blk = tile_b * out_pad * o_bytes
    resident = (bank_bytes <= _RESIDENT_BANK_BYTES) and not force_streamed

    if resident:
        kernel = _mlp_geo_kernel_resident
        in_specs = [
            pl.BlockSpec((tile_b, in_pad), lambda q, b, idx: (b, 0)),
            # Whole bank pinned in VMEM: loaded once, no per-step weight DMA,
            # no double-buffer copies.
            pl.BlockSpec(memory_space=pltpu.MemorySpace.VMEM),
            pl.BlockSpec(memory_space=pltpu.MemorySpace.VMEM),
        ]
        need = bank_bytes + 2 * (x_blk + o_blk)
    else:
        kernel = _mlp_geo_kernel_streamed
        in_specs = [
            pl.BlockSpec((tile_b, in_pad), lambda q, b, idx: (b, 0)),
            # MLP[idx[q]] gathered per step via the scalar-prefetched idxs.
            # Batch-invariant index_map + b innermost in the grid -> consecutive
            # batch tiles reuse the same weight block (revisit dedup).
            pl.BlockSpec((pl.Squeezed(), in_pad, hid_pad),
                         lambda q, b, idx: (idx[q], 0, 0)),
            pl.BlockSpec((pl.Squeezed(), hid_pad, out_pad),
                         lambda q, b, idx: (idx[q], 0, 0)),
        ]
        need = 2 * (in_pad * hid_pad + hid_pad * out_pad) * w_bytes \
            + 2 * (x_blk + o_blk)
        # TODO(synk): if this streamed path ever becomes DMA-bound (huge
        # IN/HID), add a K-reduction grid axis with an f32 VMEM accumulator
        # and consider a sublane-padded pre-transposed W2 layout.

    # Explicit VMEM budget (v7x: 64 MiB physical / 32 MiB default scoped).
    vmem_limit = int(min(max(2 * need + (1 << 20), 32 << 20), 100 << 20))

    grid_spec = pltpu.PrefetchScalarGridSpec(
        num_scalar_prefetch=1,
        grid=(num_q, num_b),
        in_specs=in_specs,
        out_specs=pl.BlockSpec((pl.Squeezed(), tile_b, out_pad),
                               lambda q, b, idx: (q, b, 0)),
    )

    out_padded = pl.pallas_call(
        kernel,
        out_shape=jax.ShapeDtypeStruct((num_q, b_pad, out_pad), x.dtype),
        grid_spec=grid_spec,
        # No cross-step accumulation (the output block index changes every
        # step), so both grid axes are "parallel" -> v7x can shard the
        # query/batch loop across its two TensorCores; no-op on v5e/v6e.
        compiler_params=pltpu.CompilerParams(
            dimension_semantics=("parallel", "parallel"),
            vmem_limit_bytes=vmem_limit),
    )(idxs, x_pad, w1p, w2p)

    return out_padded[:, :batch, :out_size]


def mlp_geo_forward(x, idx, w1p, w2p, *, out_size):
    """Pallas implementation of MLPGeo.forward(x, idx) (single idx)."""
    idxs = jnp.asarray(idx, dtype=jnp.int32).reshape((1,))
    return mlp_geo_forward_multi(x, idxs, w1p, w2p, out_size=out_size)[0]


# -----------------------------------------------------------------------------
# Init + reference (for the built-in correctness check)
# -----------------------------------------------------------------------------
def init_mlp_geo_params(key, input_size, hidden_size, output_size, amount=4,
                        dtype=jnp.float32):
    """PyTorch-style uniform fan-in init for the whole MLP bank."""
    ks = jax.random.split(key, 4)
    bound1 = 1.0 / (input_size ** 0.5)
    bound2 = 1.0 / (hidden_size ** 0.5)
    w1 = jax.random.uniform(ks[0], (amount, input_size, hidden_size),
                            dtype, -bound1, bound1)
    b1 = jax.random.uniform(ks[1], (amount, hidden_size), dtype, -bound1, bound1)
    w2 = jax.random.uniform(ks[2], (amount, hidden_size, output_size),
                            dtype, -bound2, bound2)
    b2 = jax.random.uniform(ks[3], (amount, output_size), dtype, -bound2, bound2)
    return w1, b1, w2, b2


def mlp_geo_reference(x, idx, w1, b1, w2, b2):
    hp = jax.lax.Precision.HIGHEST
    h = jnp.maximum(jnp.dot(x, w1[idx], precision=hp) + b1[idx], 0.0)
    return jnp.dot(h, w2[idx], precision=hp) + b2[idx]


if __name__ == "__main__":
    key = jax.random.PRNGKey(0)
    k_x, k_p, k_xl = jax.random.split(key, 3)

    batch, input_size, hidden_size, output_size, amount = 8, 32, 64, 16, 4

    x = jax.random.normal(k_x, (batch, input_size), dtype=jnp.float32)
    w1, b1, w2, b2 = init_mlp_geo_params(
        k_p, input_size, hidden_size, output_size, amount)

    # --- f32 packed weights: tight check, VMEM-resident bank path ------------
    w1p32, w2p32 = pack_mlp_geo_params(w1, b1, w2, b2,
                                       weight_dtype=jnp.float32)

    idx = 2  # which MLP in the bank to apply
    out = jax.block_until_ready(
        mlp_geo_forward(x, idx, w1p32, w2p32, out_size=output_size))
    ref = mlp_geo_reference(x, idx, w1, b1, w2, b2)
    assert out.shape == (batch, output_size)
    assert jnp.allclose(out, ref, atol=1e-4, rtol=1e-4)

    # --- several bank indices in one pallas_call (parallel query axis) -------
    idxs = jnp.array([0, 3, 1, 2], dtype=jnp.int32)
    outs = jax.block_until_ready(
        mlp_geo_forward_multi(x, idxs, w1p32, w2p32, out_size=output_size))
    assert outs.shape == (idxs.shape[0], batch, output_size)
    for q in range(idxs.shape[0]):
        refq = mlp_geo_reference(x, int(idxs[q]), w1, b1, w2, b2)
        assert jnp.allclose(outs[q], refq, atol=1e-4, rtol=1e-4)

    # --- streamed-weights path (what a too-big-for-VMEM bank would use) ------
    outs_s = jax.block_until_ready(
        mlp_geo_forward_multi(x, idxs, w1p32, w2p32, out_size=output_size,
                              force_streamed=True))
    assert jnp.allclose(outs_s, outs, atol=1e-5, rtol=1e-5)

    # --- larger batch: exercises the batch-tiling grid axis ------------------
    batch_l = 260
    x_l = jax.random.normal(k_xl, (batch_l, input_size), dtype=jnp.float32)
    out_l = jax.block_until_ready(
        mlp_geo_forward(x_l, 1, w1p32, w2p32, out_size=output_size))
    ref_l = mlp_geo_reference(x_l, 1, w1, b1, w2, b2)
    assert out_l.shape == (batch_l, output_size)
    assert jnp.allclose(out_l, ref_l, atol=1e-4, rtol=1e-4)

    # --- default bf16 packing (halves weight DMA / resident-bank VMEM;
    #     note x is also cast to bf16 at the MXU input) -----------------------
    w1p, w2p = pack_mlp_geo_params(w1, b1, w2, b2)     # bf16 by default
    out_bf = jax.block_until_ready(
        mlp_geo_forward(x, idx, w1p, w2p, out_size=output_size))
    assert jnp.allclose(out_bf, ref, atol=1e-1, rtol=1e-1)

    print("KERNEL_OK")
</pallas_src>

<mosaic_0001>
module attributes {stable_mosaic.version = 11 : i64} {
  func.func @_mlp_geo_kernel_resident(%arg0: i32, %arg1: i32, %arg2: memref<1xi32, #tpu.memory_space<smem>>, %arg3: memref<8x128xf32, #tpu.memory_space<vmem>>, %arg4: memref<4x128x128xf32, #tpu.memory_space<vmem>>, %arg5: memref<4x128x128xf32, #tpu.memory_space<vmem>>, %arg6: memref<1x8x128xf32, #tpu.memory_space<vmem>>) attributes {dimension_semantics = [#tpu.dimension_semantics<parallel>, #tpu.dimension_semantics<parallel>], iteration_bounds = array<i64: 1, 1>, scalar_prefetch = 1 : i64, scratch_operands = 0 : i64, tpu.core_type = #tpu.core_type<tc>, window_params = [{transform_indices = @transform_0, window_bounds = array<i64: 8, 128>}, {pipeline_mode = #tpu.pipeline_mode<synchronous>, transform_indices = @transform_1, window_bounds = array<i64: 4, 128, 128>}, {pipeline_mode = #tpu.pipeline_mode<synchronous>, transform_indices = @transform_2, window_bounds = array<i64: 4, 128, 128>}, {transform_indices = @transform_3, window_bounds = array<i64: 1, 8, 128>}]} {
    %0 = arith.index_cast %arg0 : i32 to index
    %1 = memref.load %arg2[%0] : memref<1xi32, #tpu.memory_space<smem>>
    %c0 = arith.constant 0 : index
    %c0_0 = arith.constant 0 : index
    %2 = vector.load %arg3[%c0, %c0_0] : memref<8x128xf32, #tpu.memory_space<vmem>>, vector<8x128xf32>
    %3 = arith.index_cast %1 : i32 to index
    %c0_1 = arith.constant 0 : index
    %c0_2 = arith.constant 0 : index
    %4 = vector.load %arg4[%3, %c0_1, %c0_2] : memref<4x128x128xf32, #tpu.memory_space<vmem>>, vector<1x128x128xf32>
    %5 = vector.shape_cast %4 : vector<1x128x128xf32> to vector<128x128xf32>
    %cst = arith.constant dense<0.000000e+00> : vector<8x128xf32>
    %6 = tpu.matmul %2, %5, %cst {dimension_numbers = #tpu.dot_dimension_numbers<[1], [0], [0], [1], [0, 0, 1, 1], [], []>} : vector<8x128xf32>, vector<128x128xf32>, vector<8x128xf32> -> vector<8x128xf32>
    %cst_3 = arith.constant 0.000000e+00 : f32
    %7 = vector.broadcast %cst_3 : f32 to vector<8x128xf32>
    %8 = arith.maximumf %6, %7 : vector<8x128xf32>
    %9 = arith.index_cast %1 : i32 to index
    %c0_4 = arith.constant 0 : index
    %c0_5 = arith.constant 0 : index
    %10 = vector.load %arg5[%9, %c0_4, %c0_5] : memref<4x128x128xf32, #tpu.memory_space<vmem>>, vector<1x128x128xf32>
    %11 = vector.shape_cast %10 : vector<1x128x128xf32> to vector<128x128xf32>
    %cst_6 = arith.constant dense<0.000000e+00> : vector<8x128xf32>
    %12 = tpu.matmul %8, %11, %cst_6 {dimension_numbers = #tpu.dot_dimension_numbers<[1], [0], [0], [1], [0, 0, 1, 1], [], []>} : vector<8x128xf32>, vector<128x128xf32>, vector<8x128xf32> -> vector<8x128xf32>
    %c0_7 = arith.constant 0 : index
    %c0_8 = arith.constant 0 : index
    %c0_9 = arith.constant 0 : index
    %13 = vector.load %arg6[%c0_7, %c0_8, %c0_9] : memref<1x8x128xf32, #tpu.memory_space<vmem>>, vector<1x8x128xf32>
    %14 = vector.shape_cast %13 : vector<1x8x128xf32> to vector<8x128xf32>
    %15 = vector.shape_cast %12 : vector<8x128xf32> to vector<1x8x128xf32>
    tpu.vector_store %arg6[%c0_7, %c0_8, %c0_9], %15 {strides = array<i32>} : memref<1x8x128xf32, #tpu.memory_space<vmem>>, vector<1x8x128xf32>,
    return
  }
  func.func @transform_0(%arg0: i32, %arg1: i32, %arg2: memref<1xi32, #tpu.memory_space<smem>>) -> (i32, i32) {
    %c0_i32 = arith.constant 0 : i32
    %c0_i32_0 = arith.constant 0 : i32
    return %arg1, %c0_i32 : i32, i32
  }
  func.func @transform_1(%arg0: i32, %arg1: i32, %arg2: memref<1xi32, #tpu.memory_space<smem>>) -> (i32, i32, i32) {
    %c0_i32 = arith.constant 0 : i32
    %c0_i32_0 = arith.constant 0 : i32
    %c0_i32_1 = arith.constant 0 : i32
    %c0_i32_2 = arith.constant 0 : i32
    return %c0_i32, %c0_i32_0, %c0_i32_1 : i32, i32, i32
  }
  func.func @transform_2(%arg0: i32, %arg1: i32, %arg2: memref<1xi32, #tpu.memory_space<smem>>) -> (i32, i32, i32) {
    %c0_i32 = arith.constant 0 : i32
    %c0_i32_0 = arith.constant 0 : i32
    %c0_i32_1 = arith.constant 0 : i32
    %c0_i32_2 = arith.constant 0 : i32
    return %c0_i32, %c0_i32_0, %c0_i32_1 : i32, i32, i32
  }
  func.func @transform_3(%arg0: i32, %arg1: i32, %arg2: memref<1xi32, #tpu.memory_space<smem>>) -> (i32, i32, i32) {
    %c0_i32 = arith.constant 0 : i32
    %c0_i32_0 = arith.constant 0 : i32
    return %arg0, %arg1, %c0_i32 : i32, i32, i32
  }
}

</mosaic_0001>

<bundles_post_ra>
// kernel: mlp_geo_forward_multi.1
= control target key start
LH: loop header
LB: loop body
LE: loop exit
PB: predicated region body
PF: predicated region fallthrough
CT: control target
= control target key end

     0   :  { %10 = vsyncpa [#allocation5], 0  ;;  %s604_s0 = inlined_call_operand.<no memory space> [shape: s32[1], index: 0, kind: input, shape index: {}]   ;;  %s605_s1 = inlined_call_operand.vmem [shape: f32[8,128], index: 1, kind: input, shape index: {}]   ;;  %s606_s2 = inlined_call_operand.hbm [shape: f32[4,128,128], index: 2, kind: input, shape index: {}]   ;;  %s607_s3 = inlined_call_operand.hbm [shape: f32[4,128,128], index: 3, kind: input, shape index: {}]   ;;  %s608_s4 = inlined_call_operand.hbm [shape: f32[1,8,128], index: 4, kind: output, shape index: {}]  }
   0x1   :  { %11 = vsyncpa [#allocation8], 0 }
   0x2   :  { %12 = vsyncpa [#allocation6], 0  ;;  %s477_s15 = smov [#allocation4]   ;;  %s405_s19 = scalar_lea.hbm %s606_s2, 8192 }
   0x3   :  { %s20_s16 = sshll.u32 %s477_s15, 4  ;;  %p406_p0 = scmp.ne.s32.totalorder %s606_s2, %s405_s19  ;;  %s21_s16 = int_to_ptr.vmem [resolvable:$true] %s20_s16 }
   0x4   :  { %p409_p1 = scmp.lt.u32.totalorder %s405_s19, %s606_s2 }
   0x6   :  { %p411_p2 = pnand %p409_p1, %p406_p0 }
   0x8   :  { %414 = shalt.err (!%p411_p2)
}
   0x9   :  { %s415_s24 = scalar_lea.vmem %s21_s16, 8192  ;;  %p420_p4 = scmp.lt.s32.totalorder %s21_s16, %s21_s16 }
   0xa   :  { %p416_p3 = scmp.ne.s32.totalorder %s21_s16, %s415_s24  ;;  %p421_p5 = scmp.lt.s32.totalorder %s415_s24, %s415_s24 }
   0xc   :  { %p422_p6 = por %p421_p5, %p420_p4 }
   0xe   :  { %p423_p7 = pnand %p422_p6, %p416_p3 }
  0x10   :  { %426 = shalt.err (!%p423_p7)
}
  0x11   :  { %s478_s25 = smov 128   ;;  %s479_s26 = smov 8  }
  0x12   :  { %26 = dma.hbm_to_vmem [thread:$0]  %s606_s2, 8192, %s21_s16, [#allocation5], %s478_s25, %s478_s25, %s479_s26  }
  0x13   :  { %s480_s29 = smov [#allocation7]   ;;  %s427_s7 = scalar_lea.hbm %s607_s3, 8192 }
  0x14   :  { %s32_s30 = sshll.u32 %s480_s29, 4  ;;  %p428_p8 = scmp.ne.s32.totalorder %s607_s3, %s427_s7  ;;  %s33_s30 = int_to_ptr.vmem [resolvable:$true] %s32_s30 }
  0x15   :  { %p431_p9 = scmp.lt.u32.totalorder %s427_s7, %s607_s3 }
  0x17   :  { %p433_p10 = pnand %p431_p9, %p428_p8 }
  0x19   :  { %436 = shalt.err (!%p433_p10)
}
  0x1a   :  { %s437_s12 = scalar_lea.vmem %s33_s30, 8192  ;;  %p442_p12 = scmp.lt.s32.totalorder %s33_s30, %s33_s30 }
  0x1b   :  { %p438_p11 = scmp.ne.s32.totalorder %s33_s30, %s437_s12  ;;  %p443_p13 = scmp.lt.s32.totalorder %s437_s12, %s437_s12 }
  0x1d   :  { %p444_p0 = por %p443_p13, %p442_p12 }
  0x1f   :  { %p445_p1 = pnand %p444_p0, %p438_p11 }
  0x21   :  { %448 = shalt.err (!%p445_p1)
}
  0x22   :  { %38 = dma.hbm_to_vmem [thread:$0]  %s607_s3, 8192, %s33_s30, [#allocation8], %s478_s25, %s478_s25, %s479_s26  }
  0x23   :  { %471 = dma.done.wait [#allocation5], 8192  }
  0x24   :  { %472 = vsyncadd [#allocation5], 4294959104 }
  0x25   :  { %473 = dma.done.wait [#allocation8], 8192  }
  0x26   :  { %474 = vsyncadd [#allocation8], 4294959104  ;;  %v481_v0 = vmov 0.0|0.0   ;;  %s244_s16 = sshll.u32 %s604_s0, 7  ;;  %vm482_vm0 = vmmov 0   ;;  %v483_v1 = vmov 0.0  }
  0x27   :  { %349 = vmatprep.subr.bf16.mxu0 %v481_v0  ;;  %311 = vmatprep.mubr.msk.f32.mxu0 %vm482_vm0, %v483_v1  ;;  %s539_s17 = scalar_lea.vmem [#allocation4], %s244_s16  ;;  %s548_s0 = scalar_lea.vmem [#allocation7], %s244_s16  ;;  %v46_v47 = vld [vmem:[%s605_s1] sm:$0xff] }
  0x28   :  { %373 = vmatprep.subr.bf16.mxu1 %v481_v0  ;;  %346 = vmatprep.mubr.msk.f32.mxu1 %vm482_vm0, %v483_v1  ;;  %v49_v2 = vld [vmem:[%s539_s17] sm:$0xff]  ;;  %v50_v3 = vld [vmem:[%s539_s17 + $0x8] sm:$0xff]  ;;  %v51_v4 = vld [vmem:[%s539_s17 + $0x10] sm:$0xff]  ;;  %s484_s19 = smov [#allocation9]  }
  0x29   :  { %v350_v5 = vpack.c.bf16 %v50_v3, %v49_v2  ;;  %v52_v6 = vld [vmem:[%s539_s17 + $0x18] sm:$0xff]  ;;  %v53_v8 = vld [vmem:[%s539_s17 + $0x20] sm:$0xff]  ;;  %v54_v9 = vld [vmem:[%s539_s17 + $0x28] sm:$0xff]  ;;  %s230_s20 = sshll.u32 %s484_s19, 4  ;;  %s231_s20 = int_to_ptr.vmem [resolvable:$true] %s230_s20 }
  0x2a   :  { %v353_v7 = vpack.c.bf16 %v52_v6, %v51_v4  ;;  %v137_v10 = vld [vmem:[%s548_s0] sm:$0xff]  ;;  %v138_v11 = vld [vmem:[%s548_s0 + $0x8] sm:$0xff]  ;;  %v139_v12 = vld [vmem:[%s548_s0 + $0x10] sm:$0xff]  ;;  %v356_v14 = vpack.c.bf16 %v54_v9, %v53_v8  ;;  %s449_s21 = scalar_lea.vmem %s231_s20, 128  ;;  %p454_p3 = scmp.lt.s32.totalorder %s231_s20, %s231_s20 }
  0x2b   :  { %351 = vmatpush3.bf16.msra.mxu0 %v350_v5  ;;  %v140_v13 = vld [vmem:[%s548_s0 + $0x18] sm:$0xff]  ;;  %v374_v15 = vpack.c.bf16 %v138_v11, %v137_v10  ;;  %v55_v16 = vld [vmem:[%s539_s17 + $0x30] sm:$0xff]  ;;  %v141_v19 = vld [vmem:[%s548_s0 + $0x20] sm:$0xff]  ;;  %p450_p2 = scmp.ne.s32.totalorder %s231_s20, %s449_s21  ;;  %p455_p4 = scmp.lt.s32.totalorder %s449_s21, %s449_s21 }
  0x2c   :  { %352 = vmatprep.subr.bf16.mxu0 %v481_v0  ;;  %v56_v17 = vld [vmem:[%s539_s17 + $0x38] sm:$0xff]  ;;  %v377_v18 = vpack.c.bf16 %v140_v13, %v139_v12  ;;  %v142_v20 = vld [vmem:[%s548_s0 + $0x28] sm:$0xff]  ;;  %v57_v22 = vld [vmem:[%s539_s17 + $0x40] sm:$0xff] }
  0x2d   :  { %375 = vmatpush3.bf16.msra.mxu1 %v374_v15  ;;  %v359_v21 = vpack.c.bf16 %v56_v17, %v55_v16  ;;  %v58_v23 = vld [vmem:[%s539_s17 + $0x48] sm:$0xff]  ;;  %v380_v24 = vpack.c.bf16 %v142_v20, %v141_v19  ;;  %v143_v25 = vld [vmem:[%s548_s0 + $0x30] sm:$0xff]  ;;  %v144_v26 = vld [vmem:[%s548_s0 + $0x38] sm:$0xff]  ;;  %p456_p5 = por %p455_p4, %p454_p3 }
  0x2e   :  { %376 = vmatprep.subr.bf16.mxu1 %v481_v0  ;;  %v362_v27 = vpack.c.bf16 %v58_v23, %v57_v22  ;;  %v59_v28 = vld [vmem:[%s539_s17 + $0x50] sm:$0xff]  ;;  %v60_v29 = vld [vmem:[%s539_s17 + $0x58] sm:$0xff]  ;;  %v383_v30 = vpack.c.bf16 %v144_v26, %v143_v25  ;;  %v145_v31 = vld [vmem:[%s548_s0 + $0x40] sm:$0xff] }
  0x2f   :  { %354 = vmatpush3.bf16.msra.mxu0 %v353_v7  ;;  %v146_v32 = vld [vmem:[%s548_s0 + $0x48] sm:$0xff]  ;;  %v365_v33 = vpack.c.bf16 %v60_v29, %v59_v28  ;;  %v61_v34 = vld [vmem:[%s539_s17 + $0x60] sm:$0xff]  ;;  %v147_v37 = vld [vmem:[%s548_s0 + $0x50] sm:$0xff]  ;;  %p457_p6 = pnand %p456_p5, %p450_p2 }
  0x30   :  { %355 = vmatprep.subr.bf16.mxu0 %v481_v0  ;;  %v62_v35 = vld [vmem:[%s539_s17 + $0x68] sm:$0xff]  ;;  %v386_v36 = vpack.c.bf16 %v146_v32, %v145_v31  ;;  %v148_v38 = vld [vmem:[%s548_s0 + $0x58] sm:$0xff]  ;;  %v63_v40 = vld [vmem:[%s539_s17 + $0x70] sm:$0xff] }
  0x31   :  { %378 = vmatpush3.bf16.msra.mxu1 %v377_v18  ;;  %v368_v39 = vpack.c.bf16 %v62_v35, %v61_v34  ;;  %v64_v41 = vld [vmem:[%s539_s17 + $0x78] sm:$0xff]  ;;  %v389_v42 = vpack.c.bf16 %v148_v38, %v147_v37  ;;  %v149_v43 = vld [vmem:[%s548_s0 + $0x60] sm:$0xff]  ;;  %v150_v44 = vld [vmem:[%s548_s0 + $0x68] sm:$0xff] }
  0x32   :  { %379 = vmatprep.subr.bf16.mxu1 %v481_v0  ;;  %v371_v45 = vpack.c.bf16 %v64_v41, %v63_v40  ;;  %v392_v46 = vpack.c.bf16 %v150_v44, %v149_v43  ;;  %v151_v48 = vld [vmem:[%s548_s0 + $0x70] sm:$0xff]  ;;  %v152_v49 = vld [vmem:[%s548_s0 + $0x78] sm:$0xff] }
  0x33   :  { %357 = vmatpush3.bf16.msra.mxu0 %v356_v14  ;;  %v395_v50 = vpack.c.bf16 %v152_v49, %v151_v48 }
  0x34   :  { %358 = vmatprep.subr.bf16.mxu0 %v481_v0 }
  0x35   :  { %381 = vmatpush3.bf16.msra.mxu1 %v380_v24 }
  0x36   :  { %382 = vmatprep.subr.bf16.mxu1 %v481_v0 }
  0x37   :  { %360 = vmatpush3.bf16.msra.mxu0 %v359_v21 }
  0x38   :  { %361 = vmatprep.subr.bf16.mxu0 %v481_v0 }
  0x39   :  { %384 = vmatpush3.bf16.msra.mxu1 %v383_v30 }
  0x3a   :  { %385 = vmatprep.subr.bf16.mxu1 %v481_v0 }
  0x3b   :  { %363 = vmatpush3.bf16.msra.mxu0 %v362_v27 }
  0x3c   :  { %364 = vmatprep.subr.bf16.mxu0 %v481_v0 }
  0x3d   :  { %387 = vmatpush3.bf16.msra.mxu1 %v386_v36 }
  0x3e   :  { %388 = vmatprep.subr.bf16.mxu1 %v481_v0 }
  0x3f   :  { %366 = vmatpush3.bf16.msra.mxu0 %v365_v33 }
  0x40   :  { %367 = vmatprep.subr.bf16.mxu0 %v481_v0 }
  0x41   :  { %390 = vmatpush3.bf16.msra.mxu1 %v389_v42 }
  0x42   :  { %391 = vmatprep.subr.bf16.mxu1 %v481_v0 }
  0x43   :  { %369 = vmatpush3.bf16.msra.mxu0 %v368_v39 }
  0x44   :  { %370 = vmatprep.subr.bf16.mxu0 %v481_v0 }
  0x45   :  { %393 = vmatpush3.bf16.msra.mxu1 %v392_v46 }
  0x46   :  { %394 = vmatprep.subr.bf16.mxu1 %v481_v0 }
  0x47   :  { %372 = vmatpush3.bf16.msra.mxu0 %v371_v45 }
  0x49   :  { %396 = vmatpush3.bf16.msra.mxu1 %v395_v50 }
  0x4a   :  { %312 = vmatmul.mubr.f32.vlgmr.msra.gmra.mrb[0].mxu0 %v46_v47 }
 0x11d   :  { %v131_v51 = vpop.f32.mrb[0].mxu0 }
 0x11e   :  { %v135_v52 = vmax.f32 %v131_v51, 0.0  ;;  %v313_v53 = vpop.f32.mrb[1].mxu0 }
 0x120   :  { %347 = vmatmul.mubr.f32.vlgmr.msra.gmra.mrb[0].mxu1 %v135_v52 }
 0x1f3   :  { %v219_v54 = vpop.f32.mrb[0].mxu1 }
 0x1f4   :  { %223 = vst [vmem:[#allocation9] sm:$0xff] %v219_v54  ;;  %v348_v55 = vpop.f32.mrb[1].mxu1 }
 0x1f5   :  { %460 = shalt.err (!%p457_p6)
}
 0x1f6   :  { %s461_s23 = scalar_lea.hbm %s608_s4, 128 }
 0x1f7   :  { %p462_p7 = scmp.ne.s32.totalorder %s608_s4, %s461_s23  ;;  %p465_p8 = scmp.lt.u32.totalorder %s461_s23, %s608_s4 }
 0x1f9   :  { %p467_p9 = pnand %p465_p8, %p462_p7 }
 0x1fb   :  { %470 = shalt.err (!%p467_p9)
}
 0x1fc   :  { %233 = dma.vmem_to_hbm [thread:$0]  %s231_s20, 128, %s608_s4, [#allocation6]  }
 0x1fd   :  { %475 = dma.done.wait [#allocation6], 128  }
 0x1fe   :  { %476 = vsyncadd [#allocation6], 4294967168 }
 0x1ff   :  { %237 = vsyncpa [#allocation5], 1 }
 0x200   :  { %238 = vsyncpa [#allocation8], 1 }
 0x201   :  { %239 = vsyncpa [#allocation6], 1 }

</bundles_post_ra>
